<compile_context>
chip_gen: v7x
topology: tpu7x:2x2x1
jax: 0.10.0
libtpu: 0.0.40
codegen_flags: <defaults>
</compile_context>

<pallas_src>
import jax
import jax.numpy as jnp
from jax.experimental import pallas as pl
from jax.experimental.pallas import tpu as pltpu


# ----------------------------------------------------------------------------- helpers
def conv_output_shape(h_w, kernel_size, stride):
    h = (h_w[0] - (kernel_size - 1) - 1) // stride + 1
    w = (h_w[1] - (kernel_size - 1) - 1) // stride + 1
    return (h, w)


def round_up(x, m):
    return (x + m - 1) // m * m


# ----------------------------------------------------------------------------- kernel
def icm_forward_kernel(xh_ref, w_g_ref, b_g_ref, w_hn_ref, b_hn_ref,
                       w_fc_ref, b_fc_ref, q_ref, h_ref):
    """Fused GRUCell (PyTorch gate order [r, z, n]) + Linear on one (TB, .) row tile."""
    HP = h_ref.shape[-1]                       # padded hidden (128)
    DP = xh_ref.shape[-1] - HP                 # padded input features (multiple of 128)

    xh = xh_ref[...]                           # (TB, DP+HP) bf16, lane-aligned [x | h]
    h_bf = xh[:, DP:]                          # (TB, HP) bf16 — slice at a 128-lane boundary
    h = h_bf.astype(jnp.float32)

    # One deep fused matmul for gi + gh of all three gates, plus one small matmul for gh_n.
    g = jnp.dot(xh, w_g_ref[...], preferred_element_type=jnp.float32) + b_g_ref[...]
    gh_n = jnp.dot(h_bf, w_hn_ref[...], preferred_element_type=jnp.float32) + b_hn_ref[...]

    # All gate slices land on 128-lane boundaries (whole-vreg ops).
    r = jax.nn.sigmoid(g[:, 0 * HP:1 * HP])
    z = jax.nn.sigmoid(g[:, 1 * HP:2 * HP])
    # gi_n + r*gh_n == (gi_n + gh_n) + (r - 1)*gh_n
    n = jnp.tanh(g[:, 2 * HP:3 * HP] + (r - 1.0) * gh_n)

    h_new = (1.0 - z) * n + z * h              # (TB, HP) f32
    h_ref[...] = h_new                         # lane-dense store (128 lanes)
    q_ref[...] = (jnp.dot(h_new.astype(jnp.bfloat16), w_fc_ref[...],
                          preferred_element_type=jnp.float32)
                  + b_fc_ref[...])             # lane-dense store (A padded to 128)


# ----------------------------------------------------------------------------- wrapper
def icm_agent_forward(inputs, hidden_state, packed, *, block_rows=128):
    """Returns (q, h) exactly like ICMAgent.forward (non-noisy action selector)."""
    D_in, H, A = packed["dims"]
    DP, HP, AP = packed["padded_dims"]

    B = inputs.shape[0]
    h_in = hidden_state.reshape(-1, H)

    # Row tile: 128 rows by default (fills a 128-wide MXU edge on v5e, fine on v6e/v7x);
    # small batches collapse to one multiple-of-8 tile.
    TB = min(block_rows, round_up(B, 8))
    B_pad = round_up(B, TB)

    # Lane-aligned [x | h] slab in bf16 (x padded to DP lanes so h starts at lane DP).
    x_p = jnp.pad(inputs.astype(jnp.bfloat16), ((0, B_pad - B), (0, DP - D_in)))
    h_p = jnp.pad(h_in.astype(jnp.bfloat16), ((0, B_pad - B), (0, HP - H)))
    xh = jnp.concatenate([x_p, h_p], axis=1)            # (B_pad, DP+HP)

    grid = (B_pad // TB,)

    flops = 2 * B_pad * ((DP + HP) * 3 * HP + HP * HP + HP * AP)
    transcendentals = B_pad * 3 * HP
    bytes_accessed = (B_pad * (DP + HP) * 2                       # xh (bf16)
                      + ((DP + HP) * 3 * HP + HP * HP + HP * AP) * 2   # weights (bf16)
                      + (3 * HP + HP + AP) * 4                    # biases (f32)
                      + B_pad * (AP + HP) * 4)                    # outputs (f32)

    q_pad, h_pad = pl.pallas_call(
        icm_forward_kernel,
        out_shape=(jax.ShapeDtypeStruct((B_pad, AP), jnp.float32),
                   jax.ShapeDtypeStruct((B_pad, HP), jnp.float32)),
        grid_spec=pltpu.PrefetchScalarGridSpec(
            num_scalar_prefetch=0,
            grid=grid,
            in_specs=[
                pl.BlockSpec((TB, DP + HP), lambda i: (i, 0)),        # [x|h] tile (pipelined)
                pl.BlockSpec((DP + HP, 3 * HP), lambda i: (0, 0)),    # W_g   (resident)
                pl.BlockSpec((1, 3 * HP), lambda i: (0, 0)),          # b_g
                pl.BlockSpec((HP, HP), lambda i: (0, 0)),             # W_hn
                pl.BlockSpec((1, HP), lambda i: (0, 0)),              # b_hn
                pl.BlockSpec((HP, AP), lambda i: (0, 0)),             # W_fc
                pl.BlockSpec((1, AP), lambda i: (0, 0)),              # b_fc
            ],
            out_specs=(pl.BlockSpec((TB, AP), lambda i: (i, 0)),
                       pl.BlockSpec((TB, HP), lambda i: (i, 0))),
        ),
        compiler_params=pltpu.CompilerParams(
            dimension_semantics=("parallel",)),
        cost_estimate=pl.CostEstimate(flops=flops,
                                      transcendentals=transcendentals,
                                      bytes_accessed=bytes_accessed),
    )(xh, packed["w_g"], packed["b_g"], packed["w_hn"], packed["b_hn"],
      packed["w_fc"], packed["b_fc"])

    return q_pad[:B, :A], h_pad[:B, :H]


# ----------------------------------------------------------------------------- params
def init_params(key, input_shape, hidden_dim, n_actions):
    ks = jax.random.split(key, 6)
    scale = 0.1
    # GRUCell weights, stored pre-transposed as (in, 3H) / (H, 3H); gate order [r, z, n].
    w_ih = scale * jax.random.normal(ks[0], (input_shape, 3 * hidden_dim), jnp.float32)
    w_hh = scale * jax.random.normal(ks[1], (hidden_dim, 3 * hidden_dim), jnp.float32)
    b_ih = scale * jax.random.normal(ks[2], (1, 3 * hidden_dim), jnp.float32)
    b_hh = scale * jax.random.normal(ks[3], (1, 3 * hidden_dim), jnp.float32)
    # fc2 Linear, pre-transposed to (H, n_actions).
    w_fc = scale * jax.random.normal(ks[4], (hidden_dim, n_actions), jnp.float32)
    b_fc = scale * jax.random.normal(ks[5], (1, n_actions), jnp.float32)
    return dict(w_ih=w_ih, w_hh=w_hh, b_ih=b_ih, b_hh=b_hh, w_fc=w_fc, b_fc=b_fc)


def pack_params(params, input_dim, hidden_dim, n_actions):
    """One-time re-layout: gate-padded, lane-aligned, bf16 weights for the kernel."""
    D, H, A = input_dim, hidden_dim, n_actions
    DP, HP, AP = round_up(D, 128), round_up(H, 128), round_up(A, 128)

    def pad_gates(w, rows_to):
        # (K, 3H) -> (rows_to, 3*HP): each [r|z|n] gate block padded to HP lanes with zeros.
        gates = [jnp.pad(w[:, g * H:(g + 1) * H],
                         ((0, rows_to - w.shape[0]), (0, HP - H))) for g in range(3)]
        return jnp.concatenate(gates, axis=1)

    w_ih_p = pad_gates(params["w_ih"], DP)                       # (DP, 3HP)
    w_hh_p = pad_gates(params["w_hh"], HP)                       # (HP, 3HP)
    w_g = jnp.concatenate([w_ih_p, w_hh_p], axis=0).astype(jnp.bfloat16)   # (DP+HP, 3HP)
    b_g = pad_gates(params["b_ih"] + params["b_hh"], 1).astype(jnp.float32)  # (1, 3HP)

    w_hn = jnp.pad(params["w_hh"][:, 2 * H:3 * H],
                   ((0, HP - H), (0, HP - H))).astype(jnp.bfloat16)          # (HP, HP)
    b_hn = jnp.pad(params["b_hh"][:, 2 * H:3 * H], ((0, 0), (0, HP - H)))    # (1, HP)

    w_fc = jnp.pad(params["w_fc"], ((0, HP - H), (0, AP - A))).astype(jnp.bfloat16)
    b_fc = jnp.pad(params["b_fc"], ((0, 0), (0, AP - A)))                    # (1, AP)

    return dict(w_g=w_g, b_g=b_g, w_hn=w_hn, b_hn=b_hn, w_fc=w_fc, b_fc=b_fc,
                dims=(D, H, A), padded_dims=(DP, HP, AP))


# ----------------------------------------------------------------------------- reference
def reference_forward(inputs, hidden_state, params):
    """Pure-JAX reference of PyTorch GRUCell + Linear, matching the kernel's
    bf16-matmul-operand / f32-accumulate precision so the check can be tight."""
    H = params["w_hh"].shape[0]
    h = hidden_state.reshape(-1, H)
    bf = lambda a: a.astype(jnp.bfloat16)
    gi = jnp.dot(bf(inputs), bf(params["w_ih"]),
                 preferred_element_type=jnp.float32) + params["b_ih"]
    gh = jnp.dot(bf(h), bf(params["w_hh"]),
                 preferred_element_type=jnp.float32) + params["b_hh"]
    r = jax.nn.sigmoid(gi[:, :H] + gh[:, :H])
    z = jax.nn.sigmoid(gi[:, H:2 * H] + gh[:, H:2 * H])
    n = jnp.tanh(gi[:, 2 * H:] + r * gh[:, 2 * H:])
    h_new = (1.0 - z) * n + z * bf(h).astype(jnp.float32)
    q = jnp.dot(bf(h_new), bf(params["w_fc"]),
                preferred_element_type=jnp.float32) + params["b_fc"]
    return q, h_new


# ----------------------------------------------------------------------------- main
if __name__ == "__main__":
    # Small config consistent with the module's __init__ arithmetic.
    config = {
        "num_agents": 4,
        "obs_shape": (36, 36),
        "rnn_hidden_dim": 32,
        "n_actions": 8,
        "action_selector": "epsilon_greedy",   # non-noisy path -> plain Linear fc2
    }
    # TODO(synk): the 'noisy' action_selector branch (NoisyLinear fc2) is not implemented.
    c1 = conv_output_shape((config["obs_shape"][0], config["obs_shape"][1]), 8, 4)
    c2 = conv_output_shape(c1, 4, 2)
    c3 = conv_output_shape(c2, 3, 1)
    final_flat = c3[0] * c3[1] * 64
    input_shape = final_flat + config["num_agents"]    # 64 + 4 = 68

    bs = 2
    B = bs * config["num_agents"]                      # 8 flattened agent-rows
    H = config["rnn_hidden_dim"]
    A = config["n_actions"]

    key = jax.random.PRNGKey(0)
    k_in, k_h, k_p = jax.random.split(key, 3)
    inputs = jax.random.normal(k_in, (B, input_shape), jnp.float32)
    hidden_state = jax.random.normal(k_h, (B, H), jnp.float32)
    params = init_params(k_p, input_shape, H, A)
    packed = pack_params(params, input_shape, H, A)

    q, h = icm_agent_forward(inputs, hidden_state, packed)
    q, h = jax.block_until_ready((q, h))

    q_ref, h_ref = reference_forward(inputs, hidden_state, params)
    assert q.shape == (B, A) and h.shape == (B, H)
    assert jnp.allclose(q, q_ref, atol=1e-2, rtol=1e-2), "q mismatch vs reference"
    assert jnp.allclose(h, h_ref, atol=1e-2, rtol=1e-2), "h mismatch vs reference"

    print("KERNEL_OK")
</pallas_src>

<mosaic_0001>
module attributes {stable_mosaic.version = 11 : i64} {
  func.func @icm_forward_kernel(%arg0: i32, %arg1: memref<8x256xbf16, #tpu.memory_space<vmem>>, %arg2: memref<256x384xbf16, #tpu.memory_space<vmem>>, %arg3: memref<1x384xf32, #tpu.memory_space<vmem>>, %arg4: memref<128x128xbf16, #tpu.memory_space<vmem>>, %arg5: memref<1x128xf32, #tpu.memory_space<vmem>>, %arg6: memref<128x128xbf16, #tpu.memory_space<vmem>>, %arg7: memref<1x128xf32, #tpu.memory_space<vmem>>, %arg8: memref<8x128xf32, #tpu.memory_space<vmem>>, %arg9: memref<8x128xf32, #tpu.memory_space<vmem>>) attributes {dimension_semantics = [#tpu.dimension_semantics<parallel>], iteration_bounds = array<i64: 1>, scalar_prefetch = 0 : i64, scratch_operands = 0 : i64, tpu.core_type = #tpu.core_type<tc>, window_params = [{transform_indices = @transform_0, window_bounds = array<i64: 8, 256>}, {pipeline_mode = #tpu.pipeline_mode<synchronous>, transform_indices = @transform_1, window_bounds = array<i64: 256, 384>}, {pipeline_mode = #tpu.pipeline_mode<synchronous>, transform_indices = @transform_2, window_bounds = array<i64: 1, 384>}, {pipeline_mode = #tpu.pipeline_mode<synchronous>, transform_indices = @transform_3, window_bounds = array<i64: 128, 128>}, {pipeline_mode = #tpu.pipeline_mode<synchronous>, transform_indices = @transform_4, window_bounds = array<i64: 1, 128>}, {pipeline_mode = #tpu.pipeline_mode<synchronous>, transform_indices = @transform_5, window_bounds = array<i64: 128, 128>}, {pipeline_mode = #tpu.pipeline_mode<synchronous>, transform_indices = @transform_6, window_bounds = array<i64: 1, 128>}, {transform_indices = @transform_7, window_bounds = array<i64: 8, 128>}, {transform_indices = @transform_8, window_bounds = array<i64: 8, 128>}]} {
    %c0 = arith.constant 0 : index
    %c0_0 = arith.constant 0 : index
    %0 = vector.load %arg1[%c0, %c0_0] : memref<8x256xbf16, #tpu.memory_space<vmem>>, vector<8x256xbf16>
    %1 = vector.extract_strided_slice %0 {offsets = [0, 128], sizes = [8, 128], strides = [1, 1]} : vector<8x256xbf16> to vector<8x128xbf16>
    %2 = arith.extf %1 : vector<8x128xbf16> to vector<8x128xf32>
    %c0_1 = arith.constant 0 : index
    %c0_2 = arith.constant 0 : index
    %3 = vector.load %arg2[%c0_1, %c0_2] : memref<256x384xbf16, #tpu.memory_space<vmem>>, vector<256x384xbf16>
    %cst = arith.constant dense<0.000000e+00> : vector<8x384xf32>
    %4 = tpu.matmul %0, %3, %cst {dimension_numbers = #tpu.dot_dimension_numbers<[1], [0], [0], [1], [0, 0, 1, 1], [], []>} : vector<8x256xbf16>, vector<256x384xbf16>, vector<8x384xf32> -> vector<8x384xf32>
    %c0_3 = arith.constant 0 : index
    %c0_4 = arith.constant 0 : index
    %5 = vector.load %arg3[%c0_3, %c0_4] : memref<1x384xf32, #tpu.memory_space<vmem>>, vector<1x384xf32>
    %6 = vector.broadcast %5 : vector<1x384xf32> to vector<8x384xf32>
    %7 = arith.addf %4, %6 : vector<8x384xf32>
    %c0_5 = arith.constant 0 : index
    %c0_6 = arith.constant 0 : index
    %8 = vector.load %arg4[%c0_5, %c0_6] : memref<128x128xbf16, #tpu.memory_space<vmem>>, vector<128x128xbf16>
    %cst_7 = arith.constant dense<0.000000e+00> : vector<8x128xf32>
    %9 = tpu.matmul %1, %8, %cst_7 {dimension_numbers = #tpu.dot_dimension_numbers<[1], [0], [0], [1], [0, 0, 1, 1], [], []>} : vector<8x128xbf16>, vector<128x128xbf16>, vector<8x128xf32> -> vector<8x128xf32>
    %c0_8 = arith.constant 0 : index
    %c0_9 = arith.constant 0 : index
    %10 = vector.load %arg5[%c0_8, %c0_9] : memref<1x128xf32, #tpu.memory_space<vmem>>, vector<1x128xf32>
    %11 = vector.broadcast %10 : vector<1x128xf32> to vector<8x128xf32>
    %12 = arith.addf %9, %11 : vector<8x128xf32>
    %13 = vector.extract_strided_slice %7 {offsets = [0, 0], sizes = [8, 128], strides = [1, 1]} : vector<8x384xf32> to vector<8x128xf32>
    %14 = arith.negf %13 : vector<8x128xf32>
    %15 = math.exp %14 : vector<8x128xf32>
    %cst_10 = arith.constant 1.000000e+00 : f32
    %16 = vector.broadcast %cst_10 : f32 to vector<8x128xf32>
    %17 = arith.addf %16, %15 : vector<8x128xf32>
    %18 = arith.divf %16, %17 : vector<8x128xf32>
    %19 = vector.extract_strided_slice %7 {offsets = [0, 128], sizes = [8, 128], strides = [1, 1]} : vector<8x384xf32> to vector<8x128xf32>
    %20 = arith.negf %19 : vector<8x128xf32>
    %21 = math.exp %20 : vector<8x128xf32>
    %cst_11 = arith.constant 1.000000e+00 : f32
    %22 = vector.broadcast %cst_11 : f32 to vector<8x128xf32>
    %23 = arith.addf %22, %21 : vector<8x128xf32>
    %24 = arith.divf %22, %23 : vector<8x128xf32>
    %25 = vector.extract_strided_slice %7 {offsets = [0, 256], sizes = [8, 128], strides = [1, 1]} : vector<8x384xf32> to vector<8x128xf32>
    %cst_12 = arith.constant 1.000000e+00 : f32
    %26 = vector.broadcast %cst_12 : f32 to vector<8x128xf32>
    %27 = arith.subf %18, %26 : vector<8x128xf32>
    %28 = arith.mulf %27, %12 : vector<8x128xf32>
    %29 = arith.addf %25, %28 : vector<8x128xf32>
    %30 = math.tanh %29 : vector<8x128xf32>
    %cst_13 = arith.constant 1.000000e+00 : f32
    %31 = vector.broadcast %cst_13 : f32 to vector<8x128xf32>
    %32 = arith.subf %31, %24 : vector<8x128xf32>
    %33 = arith.mulf %32, %30 : vector<8x128xf32>
    %34 = arith.mulf %24, %2 : vector<8x128xf32>
    %35 = arith.addf %33, %34 : vector<8x128xf32>
    %c0_14 = arith.constant 0 : index
    %c0_15 = arith.constant 0 : index
    %36 = vector.load %arg9[%c0_14, %c0_15] : memref<8x128xf32, #tpu.memory_space<vmem>>, vector<8x128xf32>
    tpu.vector_store %arg9[%c0_14, %c0_15], %35 {strides = array<i32>} : memref<8x128xf32, #tpu.memory_space<vmem>>, vector<8x128xf32>,
    %37 = arith.truncf %35 : vector<8x128xf32> to vector<8x128xbf16>
    %c0_16 = arith.constant 0 : index
    %c0_17 = arith.constant 0 : index
    %38 = vector.load %arg6[%c0_16, %c0_17] : memref<128x128xbf16, #tpu.memory_space<vmem>>, vector<128x128xbf16>
    %cst_18 = arith.constant dense<0.000000e+00> : vector<8x128xf32>
    %39 = tpu.matmul %37, %38, %cst_18 {dimension_numbers = #tpu.dot_dimension_numbers<[1], [0], [0], [1], [0, 0, 1, 1], [], []>} : vector<8x128xbf16>, vector<128x128xbf16>, vector<8x128xf32> -> vector<8x128xf32>
    %c0_19 = arith.constant 0 : index
    %c0_20 = arith.constant 0 : index
    %40 = vector.load %arg7[%c0_19, %c0_20] : memref<1x128xf32, #tpu.memory_space<vmem>>, vector<1x128xf32>
    %41 = vector.broadcast %40 : vector<1x128xf32> to vector<8x128xf32>
    %42 = arith.addf %39, %41 : vector<8x128xf32>
    %c0_21 = arith.constant 0 : index
    %c0_22 = arith.constant 0 : index
    %43 = vector.load %arg8[%c0_21, %c0_22] : memref<8x128xf32, #tpu.memory_space<vmem>>, vector<8x128xf32>
    tpu.vector_store %arg8[%c0_21, %c0_22], %42 {strides = array<i32>} : memref<8x128xf32, #tpu.memory_space<vmem>>, vector<8x128xf32>,
    return
  }
  func.func @transform_0(%arg0: i32) -> (i32, i32) {
    %c0_i32 = arith.constant 0 : i32
    %c0_i32_0 = arith.constant 0 : i32
    return %arg0, %c0_i32 : i32, i32
  }
  func.func @transform_1(%arg0: i32) -> (i32, i32) {
    %c0_i32 = arith.constant 0 : i32
    %c0_i32_0 = arith.constant 0 : i32
    %c0_i32_1 = arith.constant 0 : i32
    return %c0_i32, %c0_i32_0 : i32, i32
  }
  func.func @transform_2(%arg0: i32) -> (i32, i32) {
    %c0_i32 = arith.constant 0 : i32
    %c0_i32_0 = arith.constant 0 : i32
    %c0_i32_1 = arith.constant 0 : i32
    return %c0_i32, %c0_i32_0 : i32, i32
  }
  func.func @transform_3(%arg0: i32) -> (i32, i32) {
    %c0_i32 = arith.constant 0 : i32
    %c0_i32_0 = arith.constant 0 : i32
    %c0_i32_1 = arith.constant 0 : i32
    return %c0_i32, %c0_i32_0 : i32, i32
  }
  func.func @transform_4(%arg0: i32) -> (i32, i32) {
    %c0_i32 = arith.constant 0 : i32
    %c0_i32_0 = arith.constant 0 : i32
    %c0_i32_1 = arith.constant 0 : i32
    return %c0_i32, %c0_i32_0 : i32, i32
  }
  func.func @transform_5(%arg0: i32) -> (i32, i32) {
    %c0_i32 = arith.constant 0 : i32
    %c0_i32_0 = arith.constant 0 : i32
    %c0_i32_1 = arith.constant 0 : i32
    return %c0_i32, %c0_i32_0 : i32, i32
  }
  func.func @transform_6(%arg0: i32) -> (i32, i32) {
    %c0_i32 = arith.constant 0 : i32
    %c0_i32_0 = arith.constant 0 : i32
    %c0_i32_1 = arith.constant 0 : i32
    return %c0_i32, %c0_i32_0 : i32, i32
  }
  func.func @transform_7(%arg0: i32) -> (i32, i32) {
    %c0_i32 = arith.constant 0 : i32
    %c0_i32_0 = arith.constant 0 : i32
    return %arg0, %c0_i32 : i32, i32
  }
  func.func @transform_8(%arg0: i32) -> (i32, i32) {
    %c0_i32 = arith.constant 0 : i32
    %c0_i32_0 = arith.constant 0 : i32
    return %arg0, %c0_i32 : i32, i32
  }
}

</mosaic_0001>

<bundles_post_ra>
// kernel: tpu_custom_call.1
= control target key start
LH: loop header
LB: loop body
LE: loop exit
PB: predicated region body
PF: predicated region fallthrough
CT: control target
= control target key end

     0   :  { %14 = vsyncpa [#allocation3], 0  ;;  %s1351_s0 = inlined_call_operand.hbm [shape: bf16[8,256], index: 0, kind: input, shape index: {}]   ;;  %s1352_s1 = inlined_call_operand.hbm [shape: bf16[256,384], index: 1, kind: input, shape index: {}]   ;;  %s1353_s2 = inlined_call_operand.vmem [shape: f32[1,384], index: 2, kind: input, shape index: {}]   ;;  %s1354_s3 = inlined_call_operand.hbm [shape: bf16[128,128], index: 3, kind: input, shape index: {}]   ;;  %s1355_s4 = inlined_call_operand.vmem [shape: f32[1,128], index: 4, kind: input, shape index: {}]   ;;  %s1356_s5 = inlined_call_operand.hbm [shape: bf16[128,128], index: 5, kind: input, shape index: {}]   ;;  %s1357_s6 = inlined_call_operand.vmem [shape: f32[1,128], index: 6, kind: input, shape index: {}]   ;;  %s1358_s7 = inlined_call_operand.hbm [shape: f32[8,128], index: 7, kind: output, shape index: {0}]   ;;  %s1359_s8 = inlined_call_operand.hbm [shape: f32[8,128], index: 8, kind: output, shape index: {1}]  }
   0x1   :  { %15 = vsyncpa [#allocation6], 0 }
   0x2   :  { %16 = vsyncpa [#allocation9], 0 }
   0x3   :  { %17 = vsyncpa [#allocation4], 0 }
   0x4   :  { %18 = vsyncpa [#allocation12], 0  ;;  %s1186_s27 = smov [#allocation5]   ;;  %s1044_s9 = scalar_lea.hbm %s1352_s1, 6144 }
   0x5   :  { %s34_s28 = sshll.u32 %s1186_s27, 4  ;;  %p1045_p0 = scmp.ne.s32.totalorder %s1352_s1, %s1044_s9  ;;  %s35_s28 = int_to_ptr.vmem [resolvable:$true] %s34_s28 }
   0x6   :  { %p1048_p1 = scmp.lt.u32.totalorder %s1044_s9, %s1352_s1 }
   0x8   :  { %p1050_p2 = pnand %p1048_p1, %p1045_p0 }
   0xa   :  { %1053 = shalt.err (!%p1050_p2)
}
   0xb   :  { %s1054_s14 = scalar_lea.vmem %s35_s28, 6144  ;;  %p1059_p4 = scmp.lt.s32.totalorder %s35_s28, %s35_s28 }
   0xc   :  { %p1055_p3 = scmp.ne.s32.totalorder %s35_s28, %s1054_s14  ;;  %p1060_p5 = scmp.lt.s32.totalorder %s1054_s14, %s1054_s14 }
   0xe   :  { %p1061_p6 = por %p1060_p5, %p1059_p4 }
  0x10   :  { %p1062_p7 = pnand %p1061_p6, %p1055_p3 }
  0x12   :  { %1065 = shalt.err (!%p1062_p7)
}
  0x13   :  { %s1187_s15 = smov 192   ;;  %s1188_s16 = smov 12  }
  0x14   :  { %40 = dma.hbm_to_vmem [thread:$0]  %s1352_s1, 6144, %s35_s28, [#allocation6], %s1187_s15, %s1187_s15, %s1188_s16  }
  0x15   :  { %s1189_s19 = smov [#allocation2]   ;;  %s1190_s21 = smov [#allocation7]  }
  0x16   :  { %s25_s20 = sshll.u32 %s1189_s19, 4  ;;  %s48_s22 = sshll.u32 %s1190_s21, 4  ;;  %s26_s20 = int_to_ptr.vmem [resolvable:$true] %s25_s20  ;;  %s49_s22 = int_to_ptr.vmem [resolvable:$true] %s48_s22 }
  0x17   :  { %s1066_s25 = scalar_lea.hbm %s1351_s0, 128 }
  0x18   :  { %p1067_p8 = scmp.ne.s32.totalorder %s1351_s0, %s1066_s25  ;;  %p1070_p9 = scmp.lt.u32.totalorder %s1066_s25, %s1351_s0 }
  0x1a   :  { %p1072_p10 = pnand %p1070_p9, %p1067_p8 }
  0x1c   :  { %1075 = shalt.err (!%p1072_p10)
}
  0x1d   :  { %s1076_s1 = scalar_lea.vmem %s26_s20, 128  ;;  %p1081_p12 = scmp.lt.s32.totalorder %s26_s20, %s26_s20 }
  0x1e   :  { %p1077_p11 = scmp.ne.s32.totalorder %s26_s20, %s1076_s1  ;;  %p1082_p13 = scmp.lt.s32.totalorder %s1076_s1, %s1076_s1 }
  0x20   :  { %p1083_p0 = por %p1082_p13, %p1081_p12 }
  0x22   :  { %p1084_p1 = pnand %p1083_p0, %p1077_p11 }
  0x24   :  { %1087 = shalt.err (!%p1084_p1)
}
  0x25   :  { %28 = dma.hbm_to_vmem [thread:$0]  %s1351_s0, 128, %s26_s20, [#allocation3]  }
  0x26   :  { %s1088_s12 = scalar_lea.hbm %s1354_s3, 1024 }
  0x27   :  { %p1089_p2 = scmp.ne.s32.totalorder %s1354_s3, %s1088_s12  ;;  %p1092_p3 = scmp.lt.u32.totalorder %s1088_s12, %s1354_s3 }
  0x29   :  { %p1094_p4 = pnand %p1092_p3, %p1089_p2 }
  0x2b   :  { %1097 = shalt.err (!%p1094_p4)
}
  0x2c   :  { %s1098_s17 = scalar_lea.vmem %s49_s22, 1024  ;;  %p1103_p6 = scmp.lt.s32.totalorder %s49_s22, %s49_s22 }
  0x2d   :  { %p1099_p5 = scmp.ne.s32.totalorder %s49_s22, %s1098_s17  ;;  %p1104_p7 = scmp.lt.s32.totalorder %s1098_s17, %s1098_s17 }
  0x2f   :  { %p1105_p8 = por %p1104_p7, %p1103_p6 }
  0x31   :  { %p1106_p9 = pnand %p1105_p8, %p1099_p5 }
  0x33   :  { %1109 = shalt.err (!%p1106_p9)
}
  0x34   :  { %s1191_s0 = smov 64   ;;  %s1192_s18 = smov 4  }
  0x35   :  { %54 = dma.hbm_to_vmem [thread:$0]  %s1354_s3, 1024, %s49_s22, [#allocation6], %s1191_s0, %s1191_s0, %s1192_s18  }
  0x36   :  { %s1193_s21 = smov [#allocation8]   ;;  %s1110_s26 = scalar_lea.hbm %s1356_s5, 1024 }
  0x37   :  { %s62_s23 = sshll.u32 %s1193_s21, 4  ;;  %p1111_p10 = scmp.ne.s32.totalorder %s1356_s5, %s1110_s26  ;;  %s63_s23 = int_to_ptr.vmem [resolvable:$true] %s62_s23 }
  0x38   :  { %p1114_p11 = scmp.lt.u32.totalorder %s1110_s26, %s1356_s5 }
  0x3a   :  { %p1116_p12 = pnand %p1114_p11, %p1111_p10 }
  0x3c   :  { %1119 = shalt.err (!%p1116_p12)
}
  0x3d   :  { %s1120_s28 = scalar_lea.vmem %s63_s23, 1024  ;;  %p1125_p0 = scmp.lt.s32.totalorder %s63_s23, %s63_s23 }
  0x3e   :  { %p1121_p13 = scmp.ne.s32.totalorder %s63_s23, %s1120_s28  ;;  %p1126_p1 = scmp.lt.s32.totalorder %s1120_s28, %s1120_s28 }
  0x40   :  { %p1127_p2 = por %p1126_p1, %p1125_p0 }
  0x42   :  { %p1128_p3 = pnand %p1127_p2, %p1121_p13 }
  0x44   :  { %1131 = shalt.err (!%p1128_p3)
}
  0x45   :  { %68 = dma.hbm_to_vmem [thread:$0]  %s1356_s5, 1024, %s63_s23, [#allocation9], %s1191_s0, %s1191_s0, %s1192_s18  }
  0x46   :  { %1176 = dma.done.wait [#allocation3], 128  }
  0x47   :  { %1177 = vsyncadd [#allocation3], 4294967168 }
  0x48   :  { %1178 = dma.done.wait [#allocation6], 7168  }
  0x49   :  { %1179 = vsyncadd [#allocation6], 4294960128 }
  0x4a   :  { %1180 = dma.done.wait [#allocation9], 1024  }
  0x4b   :  { %1181 = vsyncadd [#allocation9], 4294966272  ;;  %v952_v0 = vld [vmem:[#allocation5 + $0x4] ss:$12 sps:$4 sm:$0xff]   ;;  %v954_v1 = vld [vmem:[#allocation5] ss:$12 sps:$4 sm:$0xff]  }
  0x4c   :  { %432 = vmatprep.subr.bf16.mxu0 %v952_v0  ;;  %v955_v2 = vld [vmem:[#allocation5 + $0x1c] ss:$12 sps:$4 sm:$0xff]   ;;  %v957_v3 = vld [vmem:[#allocation5 + $0x18] ss:$12 sps:$4 sm:$0xff]   ;;  %v958_v4 = vld [vmem:[#allocation5 + $0x34] ss:$12 sps:$4 sm:$0xff]  }
  0x4d   :  { %433 = vmatpush1.bf16.msra.mxu0 %v954_v1  ;;  %v960_v5 = vld [vmem:[#allocation5 + $0x30] ss:$12 sps:$4 sm:$0xff]   ;;  %v961_v6 = vld [vmem:[#allocation5 + $0x4c] ss:$12 sps:$4 sm:$0xff]   ;;  %v963_v7 = vld [vmem:[#allocation5 + $0x48] ss:$12 sps:$4 sm:$0xff]  }
  0x4e   :  { %434 = vmatprep.subr.bf16.mxu0 %v955_v2  ;;  %v973_v8 = vld [vmem:[#allocation5 + $0xc8] ss:$12 sps:$4 sm:$0xff]   ;;  %v964_v10 = vld [vmem:[#allocation5 + $0x64] ss:$12 sps:$4 sm:$0xff]   ;;  %v978_v11 = vld [vmem:[#allocation5 + $0xe0] ss:$12 sps:$4 sm:$0xff]  }
  0x4f   :  { %v974_v9 = vld [vmem:[#allocation5 + $0x8] ss:$12 sps:$4 sm:$0xff]   ;;  %860 = vmatprep.subr.bf16.mxu1 %v973_v8  ;;  %v979_v12 = vld [vmem:[#allocation5 + $0x20] ss:$12 sps:$4 sm:$0xff]   ;;  %v983_v15 = vld [vmem:[#allocation5 + $0xf8] ss:$12 sps:$4 sm:$0xff]  }
  0x50   :  { %861 = vmatpush3.bf16.msra.mxu1 %v974_v9  ;;  %v966_v13 = vld [vmem:[#allocation5 + $0x60] ss:$12 sps:$4 sm:$0xff]   ;;  %v967_v14 = vld [vmem:[#allocation5 + $0x7c] ss:$12 sps:$4 sm:$0xff]   ;;  %v984_v16 = vld [vmem:[#allocation5 + $0x38] ss:$12 sps:$4 sm:$0xff]   ;;  %v155_v9 = vlaneseq }
  0x51   :  { %435 = vmatpush1.bf16.msra.mxu0 %v957_v3  ;;  %862 = vmatprep.subr.bf16.mxu1 %v978_v11  ;;  %v969_v17 = vld [vmem:[#allocation5 + $0x78] ss:$12 sps:$4 sm:$0xff]   ;;  %v970_v18 = vld [vmem:[#allocation5 + $0x94] ss:$12 sps:$4 sm:$0xff]   ;;  %v988_v19 = vld [vmem:[#allocation5 + $0x110] ss:$12 sps:$4 sm:$0xff]  }
  0x52   :  { %436 = vmatprep.subr.bf16.mxu0 %v958_v4  ;;  %v989_v20 = vld [vmem:[#allocation5 + $0x50] ss:$12 sps:$4 sm:$0xff]   ;;  %v993_v22 = vld [vmem:[#allocation5 + $0x128] ss:$12 sps:$4 sm:$0xff]   ;;  %v975_v23 = vld [vmem:[#allocation5 + $0xac] ss:$12 sps:$4 sm:$0xff]  }
  0x53   :  { %v972_v21 = vld [vmem:[#allocation5 + $0x90] ss:$12 sps:$4 sm:$0xff]   ;;  %v994_v24 = vld [vmem:[#allocation5 + $0x68] ss:$12 sps:$4 sm:$0xff]   ;;  %v998_v25 = vld [vmem:[#allocation5 + $0x140] ss:$12 sps:$4 sm:$0xff]  }
  0x54   :  { %863 = vmatpush3.bf16.msra.mxu1 %v979_v12  ;;  %v977_v26 = vld [vmem:[#allocation5 + $0xa8] ss:$12 sps:$4 sm:$0xff]   ;;  %v980_v27 = vld [vmem:[#allocation5 + $0xc4] ss:$12 sps:$4 sm:$0xff]   ;;  %v999_v28 = vld [vmem:[#allocation5 + $0x80] ss:$12 sps:$4 sm:$0xff]  }
  0x55   :  { %437 = vmatpush1.bf16.msra.mxu0 %v960_v5  ;;  %864 = vmatprep.subr.bf16.mxu1 %v983_v15  ;;  %v1003_v29 = vld [vmem:[#allocation5 + $0x158] ss:$12 sps:$4 sm:$0xff]   ;;  %v982_v30 = vld [vmem:[#allocation5 + $0xc0] ss:$12 sps:$4 sm:$0xff]   ;;  %v985_v31 = vld [vmem:[#allocation5 + $0xdc] ss:$12 sps:$4 sm:$0xff]  }
  0x56   :  { %438 = vmatprep.subr.bf16.mxu0 %v961_v6  ;;  %v1004_v32 = vld [vmem:[#allocation5 + $0x98] ss:$12 sps:$4 sm:$0xff]   ;;  %v1008_v33 = vld [vmem:[#allocation5 + $0x170] ss:$12 sps:$4 sm:$0xff]   ;;  %v990_v35 = vld [vmem:[#allocation5 + $0xf4] ss:$12 sps:$4 sm:$0xff]  }
  0x57   :  { %v987_v34 = vld [vmem:[#allocation5 + $0xd8] ss:$12 sps:$4 sm:$0xff]   ;;  %v1009_v37 = vld [vmem:[#allocation5 + $0xb0] ss:$12 sps:$4 sm:$0xff]   ;;  %v1194_v43 = vmov 0.0   ;;  %v1019_v47 = vld [vmem:[#allocation7 + $0x8] sm:$0xff]  }
  0x58   :  { %865 = vmatpush3.bf16.msra.mxu1 %v984_v16  ;;  %v1291_v36 = vld [vmem:[#allocation2] sm:$0xff]  ;;  %v1015_v42 = vld [vmem:[#allocation7] sm:$0xff]   ;;  %v997_v44 = vld [vmem:[#allocation5 + $0x108] ss:$12 sps:$4 sm:$0xff]   ;;  %vm1195_vm0 = vmmov 0   ;;  %s1196_s11 = smov [#allocation11]  }
  0x59   :  { %439 = vmatpush1.bf16.msra.mxu0 %v963_v7  ;;  %866 = vmatprep.subr.bf16.mxu1 %v988_v19  ;;  %v790_v38 = vcombine.high %v1291_v36, %v1291_v36  ;;  %v992_v39 = vld [vmem:[#allocation5 + $0xf0] ss:$12 sps:$4 sm:$0xff]   ;;  %v995_v40 = vld [vmem:[#allocation5 + $0x10c] ss:$12 sps:$4 sm:$0xff]   ;;  %v789_v41 = vcombine.low %v1291_v36, %v1291_v36  ;;  %v1010_v51 = vld [vmem:[#allocation5 + $0x154] ss:$12 sps:$4 sm:$0xff]  }
  0x5a   :  { %440 = vmatprep.subr.bf16.mxu0 %v964_v10  ;;  %v1000_v45 = vld [vmem:[#allocation5 + $0x124] ss:$12 sps:$4 sm:$0xff]   ;;  %v1002_v46 = vld [vmem:[#allocation5 + $0x120] ss:$12 sps:$4 sm:$0xff]   ;;  %v1005_v48 = vld [vmem:[#allocation5 + $0x13c] ss:$12 sps:$4 sm:$0xff]  }
  0x5b   :  { %505 = vmatprep.mubr.bf16.mxu1 %v790_v38  ;;  %464 = vmatprep.mubr.bf16.mxu0 %v790_v38  ;;  %v1020_v49 = vld [vmem:[#allocation7 + $0x10] sm:$0xff]   ;;  %v1007_v50 = vld [vmem:[#allocation5 + $0x138] ss:$12 sps:$4 sm:$0xff]   ;;  %v1023_v57 = vld [vmem:[#allocation7 + $0x28] sm:$0xff]   ;;  %v156_v10 = vshrl.u32 %v155_v9, 7 }
  0x5c   :  { %867 = vmatpush3.bf16.msra.mxu1 %v989_v20  ;;  %v1021_v52 = vld [vmem:[#allocation7 + $0x18] sm:$0xff]   ;;  %v1022_v55 = vld [vmem:[#allocation7 + $0x20] sm:$0xff]   ;;  %v1018_v56 = vld [vmem:[#allocation5 + $0x168] ss:$12 sps:$4 sm:$0xff]  }
  0x5d   :  { %441 = vmatpush1.bf16.msra.mxu0 %v966_v13  ;;  %868 = vmatprep.subr.bf16.mxu1 %v993_v22  ;;  %v1012_v53 = vld [vmem:[#allocation5 + $0x150] ss:$12 sps:$4 sm:$0xff]   ;;  %v1016_v54 = vld [vmem:[#allocation5 + $0x16c] ss:$12 sps:$4 sm:$0xff]   ;;  %v1026_v60 = vld [vmem:[#allocation8] sm:$0xff]   ;;  %v157_v11 = vsub.s32 0, %v156_v10 }
  0x5e   :  { %442 = vmatprep.subr.bf16.mxu0 %v967_v14  ;;  %v1024_v58 = vld [vmem:[#allocation7 + $0x30] sm:$0xff]   ;;  %v1025_v59 = vld [vmem:[#allocation7 + $0x38] sm:$0xff]   ;;  %v1027_v61 = vld [vmem:[#allocation8 + $0x8] sm:$0xff]   ;;  %v161_v13 = vsub.s32 1, %v156_v10 }
  0x5f   :  { %v1028_v62 = vld [vmem:[#allocation8 + $0x10] sm:$0xff]   ;;  %v1029_v63 = vld [vmem:[#allocation8 + $0x18] sm:$0xff]   ;;  %v1030_v0 = vld [vmem:[#allocation8 + $0x20] sm:$0xff]  }
  0x60   :  { %869 = vmatpush3.bf16.msra.mxu1 %v994_v24  ;;  %v1031_v1 = vld [vmem:[#allocation8 + $0x28] sm:$0xff]   ;;  %v1032_v2 = vld [vmem:[#allocation8 + $0x30] sm:$0xff]   ;;  %v1033_v3 = vld [vmem:[#allocation8 + $0x38] sm:$0xff]  }
  0x61   :  { %443 = vmatpush1.bf16.msra.mxu0 %v969_v17  ;;  %870 = vmatprep.subr.bf16.mxu1 %v998_v25  ;;  %v153_v12 = vld [vmem:[%s1353_s2] sm:$0x7] }
  0x62   :  { %444 = vmatprep.subr.bf16.mxu0 %v970_v18  ;;  %v158_v14 = vrot.slane %v153_v12, %v157_v11  ;;  %v162_v15 = vrot.slane %v153_v12, %v161_v13 }
  0x64   :  { %871 = vmatpush3.bf16.msra.mxu1 %v999_v28 }
  0x65   :  { %445 = vmatpush1.bf16.msra.mxu0 %v972_v21  ;;  %872 = vmatprep.subr.bf16.mxu1 %v1003_v29 }
  0x66   :  { %446 = vmatprep.subr.bf16.mxu0 %v975_v23 }
  0x68   :  { %873 = vmatpush3.bf16.msra.mxu1 %v1004_v32  ;;  %v86_v32 = vrot.slane %v1291_v36, 4 }
  0x69   :  { %447 = vmatpush1.bf16.msra.mxu0 %v977_v26  ;;  %874 = vmatprep.subr.bf16.mxu1 %v1008_v33  ;;  %v165_v33 = vsub.s32 2, %v156_v10 }
  0x6a   :  { %448 = vmatprep.subr.bf16.mxu0 %v980_v27 }
  0x6c   :  { %875 = vmatpush3.bf16.msra.mxu1 %v1009_v37  ;;  %v166_v37 = vrot.slane %v153_v12, %v165_v33 }
  0x6d   :  { %449 = vmatpush1.bf16.msra.mxu0 %v982_v30  ;;  %900 = vmatprep.subr.bf16.mxu1 %v1194_v43 }
  0x6e   :  { %450 = vmatprep.subr.bf16.mxu0 %v985_v31 }
  0x6f   :  { %506 = vmatmul.mubr.bf16.vlgmr.msra.gmra.mrb[0].mxu1 %v789_v41 }
  0x70   :  { %901 = vmatpush3.bf16.msra.mxu1 %v1015_v42  ;;  %916 = vmatprep.mubr.msk.bf16.mxu1 %vm1195_vm0, %v1194_v43 }
  0x71   :  { %451 = vmatpush1.bf16.msra.mxu0 %v987_v34  ;;  %902 = vmatprep.subr.bf16.mxu1 %v1194_v43  ;;  %v839_v34 = vld [vmem:[%s1355_s4] ss:$0 sm:$0xff]  ;;  %s774_s4 = sshll.u32 %s1196_s11, 4  ;;  %s775_s4 = int_to_ptr.vmem [resolvable:$true] %s774_s4 }
  0x72   :  { %452 = vmatprep.subr.bf16.mxu0 %v990_v35  ;;  %v88_v35 = vunpack.c.l.bf16 %v86_v32  ;;  %s1132_s12 = scalar_lea.vmem %s775_s4, 128  ;;  %p1137_p5 = scmp.lt.s32.totalorder %s775_s4, %s775_s4 }
  0x73   :  { %p1133_p4 = scmp.ne.s32.totalorder %s775_s4, %s1132_s12  ;;  %p1138_p6 = scmp.lt.s32.totalorder %s1132_s12, %s1132_s12 }
  0x74   :  { %903 = vmatpush3.bf16.msra.mxu1 %v1019_v47 }
  0x75   :  { %453 = vmatpush1.bf16.msra.mxu0 %v992_v39  ;;  %904 = vmatprep.subr.bf16.mxu1 %v1194_v43  ;;  %p1139_p7 = por %p1138_p6, %p1137_p5 }
  0x76   :  { %454 = vmatprep.subr.bf16.mxu0 %v995_v40 }
  0x77   :  { %p1140_p8 = pnand %p1139_p7, %p1133_p4 }
  0x78   :  { %905 = vmatpush3.bf16.msra.mxu1 %v1020_v49 }
  0x79   :  { %455 = vmatpush1.bf16.msra.mxu0 %v997_v44  ;;  %906 = vmatprep.subr.bf16.mxu1 %v1194_v43 }
  0x7a   :  { %456 = vmatprep.subr.bf16.mxu0 %v1000_v45 }
  0x7c   :  { %907 = vmatpush3.bf16.msra.mxu1 %v1021_v52 }
  0x7d   :  { %457 = vmatpush1.bf16.msra.mxu0 %v1002_v46  ;;  %908 = vmatprep.subr.bf16.mxu1 %v1194_v43 }
  0x7e   :  { %458 = vmatprep.subr.bf16.mxu0 %v1005_v48 }
  0x80   :  { %909 = vmatpush3.bf16.msra.mxu1 %v1022_v55 }
  0x81   :  { %459 = vmatpush1.bf16.msra.mxu0 %v1007_v50  ;;  %910 = vmatprep.subr.bf16.mxu1 %v1194_v43 }
  0x82   :  { %460 = vmatprep.subr.bf16.mxu0 %v1010_v51 }
  0x84   :  { %911 = vmatpush3.bf16.msra.mxu1 %v1023_v57 }
  0x85   :  { %461 = vmatpush1.bf16.msra.mxu0 %v1012_v53  ;;  %912 = vmatprep.subr.bf16.mxu1 %v1194_v43 }
  0x86   :  { %462 = vmatprep.subr.bf16.mxu0 %v1016_v54 }
  0x88   :  { %913 = vmatpush3.bf16.msra.mxu1 %v1024_v58 }
  0x89   :  { %463 = vmatpush1.bf16.msra.mxu0 %v1018_v56  ;;  %914 = vmatprep.subr.bf16.mxu1 %v1194_v43 }
  0x8a   :  { %920 = vmatprep.subr.bf16.mxu0 %v1194_v43 }
  0x8c   :  { %465 = vmatmul.mubr.bf16.vlgmr.msra.gmra.mrb[0].mxu0 %v789_v41  ;;  %915 = vmatpush3.bf16.msra.mxu1 %v1025_v59 }
  0x8d   :  { %936 = vmatprep.mubr.msk.bf16.mxu0 %vm1195_vm0, %v1194_v43  ;;  %921 = vmatpush3.bf16.msra.mxu0 %v1026_v60 }
  0x8e   :  { %922 = vmatprep.subr.bf16.mxu0 %v1194_v43 }
  0x8f   :  { %917 = vmatmul.mubr.bf16.vlgmr.msra.gmra.mrb[4].mxu1 %v790_v38 }
  0x91   :  { %923 = vmatpush3.bf16.msra.mxu0 %v1027_v61 }
  0x92   :  { %924 = vmatprep.subr.bf16.mxu0 %v1194_v43 }
  0x95   :  { %925 = vmatpush3.bf16.msra.mxu0 %v1028_v62 }
  0x96   :  { %926 = vmatprep.subr.bf16.mxu0 %v1194_v43 }
  0x99   :  { %927 = vmatpush3.bf16.msra.mxu0 %v1029_v63 }
  0x9a   :  { %928 = vmatprep.subr.bf16.mxu0 %v1194_v43 }
  0x9d   :  { %929 = vmatpush3.bf16.msra.mxu0 %v1030_v0 }
  0x9e   :  { %930 = vmatprep.subr.bf16.mxu0 %v1194_v43 }
  0xa1   :  { %931 = vmatpush3.bf16.msra.mxu0 %v1031_v1 }
  0xa2   :  { %932 = vmatprep.subr.bf16.mxu0 %v1194_v43 }
  0xa5   :  { %933 = vmatpush3.bf16.msra.mxu0 %v1032_v2 }
  0xa6   :  { %934 = vmatprep.subr.bf16.mxu0 %v1194_v43 }
  0xa9   :  { %935 = vmatpush3.bf16.msra.mxu0 %v1033_v3 }
 0x142   :  { %v876_v4 = vpop.f32.mrb[0].mxu1 }
 0x143   :  { %v877_v5 = vpop.f32.mrb[1].mxu1 }
 0x144   :  { %v878_v6 = vadd.f32 %v877_v5, %v876_v4  ;;  %v879_v7 = vpop.f32.mrb[2].mxu1 }
 0x145   :  { %v880_v8 = vpop.f32.mrb[3].mxu1 }
 0x146   :  { %v508_v43 = vadd.f32 %v878_v6, %v166_v37 }
 0x15f   :  { %v466_v16 = vpop.f32.mrb[0].mxu0 }
 0x160   :  { %v467_v17 = vadd.f32 %v466_v16, %v158_v14  ;;  %v468_v18 = vpop.f32.mrb[1].mxu0 }
 0x161   :  { %v469_v19 = vadd.f32 %v468_v18, %v162_v15  ;;  %v470_v20 = vpop.f32.mrb[2].mxu0 }
 0x162   :  { %v848_v21 = vmul.f32 -1.442695, %v467_v17  ;;  %v471_v22 = vpop.f32.mrb[3].mxu0  ;;  %v618_v24 = vpop.f32.mrb[4].mxu1 }
 0x163   :  { %v849_v23 = vmul.f32 -1.442695, %v469_v19  ;;  %v918_v25 = vpop.f32.mrb[5].mxu1  ;;  %v619_v38 = vadd.f32 %v839_v34, %v618_v24 }
 0x164   :  { %1034 = vpow2.f32 %v848_v21  ;;  %v621_v26 = vpop.f32.mrb[6].mxu1 }
 0x165   :  { %1036 = vpow2.f32 %v849_v23  ;;  %v919_v27 = vpop.f32.mrb[7].mxu1 }
 0x16e   :  { %v1035_v28 = vpop.eup %1034 }
 0x16f   :  { %v1037_v29 = vpop.eup %1036  ;;  %v627_v30 = vadd.f32 1.0, %v1035_v28 }
 0x170   :  { %v633_v31 = vadd.f32 1.0, %v1037_v29 }
 0x171   :  { %1038 = vrcp.f32 %v627_v30 }
 0x172   :  { %1040 = vrcp.f32 %v633_v31 }
 0x17b   :  { %v1039_v39 = vpop.eup %1038 }
 0x17c   :  { %v1041_v40 = vpop.eup %1040  ;;  %v850_v41 = vadd.f32 -1.0, %v1039_v39 }
 0x17d   :  { %v642_v42 = vmul.f32 %v1041_v40, %v88_v35  ;;  %v640_v46 = vsub.f32 1.0, %v1041_v40 }
 0x17e   :  { %v637_v44 = vmul.f32 %v850_v41, %v619_v38 }
 0x180   :  { %v638_v45 = vadd.f32 %v637_v44, %v508_v43 }
 0x182   :  { %1042 = vtanh.f32 %v638_v45 }
 0x18c   :  { %v1043_v47 = vpop.eup %1042 }
 0x18d   :  { %v641_v48 = vmul.f32 %v1043_v47, %v640_v46 }
 0x18f   :  { %v643_v36 = vadd.f32 %v642_v42, %v641_v48 }
 0x191   :  { %v645_v49 = vpack.c.bf16 %v643_v36, %v643_v36  ;;  %644 = vst [vmem:[#allocation11] sm:$0xff] %v643_v36 }
 0x193   :  { %937 = vmatmul.mubr.bf16.vlgmr.msra.gmra.mrb[4].mxu0 %v645_v49 }
 0x194   :  { %1143 = shalt.err (!%p1140_p8)
}
 0x195   :  { %s1144_s15 = scalar_lea.hbm %s1359_s8, 128 }
 0x196   :  { %p1145_p9 = scmp.ne.s32.totalorder %s1359_s8, %s1144_s15  ;;  %p1148_p10 = scmp.lt.u32.totalorder %s1144_s15, %s1359_s8 }
 0x198   :  { %p1150_p11 = pnand %p1148_p10, %p1145_p9 }
 0x19a   :  { %1153 = shalt.err (!%p1150_p11)
}
 0x19b   :  { %777 = dma.vmem_to_hbm [thread:$0]  %s775_s4, 128, %s1359_s8, [#allocation12]   ;;  %v851_v50 = vld [vmem:[%s1357_s6] ss:$0 sm:$0xff] }
 0x19c   :  { %s1197_s24 = smov [#allocation10]  }
 0x19d   :  { %s764_s25 = sshll.u32 %s1197_s24, 4  ;;  %s765_s25 = int_to_ptr.vmem [resolvable:$true] %s764_s25 }
 0x19e   :  { %s1154_s26 = scalar_lea.vmem %s765_s25, 128  ;;  %p1159_p13 = scmp.lt.s32.totalorder %s765_s25, %s765_s25 }
 0x19f   :  { %p1155_p12 = scmp.ne.s32.totalorder %s765_s25, %s1154_s26  ;;  %p1160_p0 = scmp.lt.s32.totalorder %s1154_s26, %s1154_s26 }
 0x1a1   :  { %p1161_p1 = por %p1160_p0, %p1159_p13 }
 0x1a3   :  { %p1162_p2 = pnand %p1161_p1, %p1155_p12 }
 0x266   :  { %v751_v51 = vpop.f32.mrb[4].mxu0 }
 0x267   :  { %v752_v52 = vadd.f32 %v851_v50, %v751_v51  ;;  %v938_v53 = vpop.f32.mrb[5].mxu0 }
 0x268   :  { %v754_v54 = vpop.f32.mrb[6].mxu0 }
 0x269   :  { %757 = vst [vmem:[#allocation10] sm:$0xff] %v752_v52  ;;  %v939_v55 = vpop.f32.mrb[7].mxu0 }
 0x26a   :  { %1165 = shalt.err (!%p1162_p2)
}
 0x26b   :  { %s1166_s6 = scalar_lea.hbm %s1358_s7, 128 }
 0x26c   :  { %p1167_p3 = scmp.ne.s32.totalorder %s1358_s7, %s1166_s6  ;;  %p1170_p4 = scmp.lt.u32.totalorder %s1166_s6, %s1358_s7 }
 0x26e   :  { %p1172_p5 = pnand %p1170_p4, %p1167_p3 }
 0x270   :  { %1175 = shalt.err (!%p1172_p5)
}
 0x271   :  { %767 = dma.vmem_to_hbm [thread:$0]  %s765_s25, 128, %s1358_s7, [#allocation4]  }
 0x272   :  { %1182 = dma.done.wait [#allocation4], 128  }
 0x273   :  { %1183 = vsyncadd [#allocation4], 4294967168 }
 0x274   :  { %1184 = dma.done.wait [#allocation12], 128  }
 0x275   :  { %1185 = vsyncadd [#allocation12], 4294967168 }
 0x276   :  { %784 = vsyncpa [#allocation3], 1 }
 0x277   :  { %785 = vsyncpa [#allocation6], 1 }
 0x278   :  { %786 = vsyncpa [#allocation9], 1 }
 0x279   :  { %787 = vsyncpa [#allocation4], 1 }
 0x27a   :  { %788 = vsyncpa [#allocation12], 1 }

</bundles_post_ra>
